<compile_context>
chip_gen: v7x
topology: tpu7x:2x2x1
jax: 0.10.0
libtpu: 0.0.40
codegen_flags: <defaults>
</compile_context>

<pallas_src>
import jax
import jax.numpy as jnp
from jax.experimental import pallas as pl
from jax.experimental.pallas import tpu as pltpu


# ------------------------------ Pallas kernel -------------------------------

def _ca_kernel(x_ref, w1_ref, b1_ref, w2_ref, b2_ref, o_ref):
    # x_ref: (TB, C, HW)   w1: (C, Ch)  b1: (1, Ch)  w2: (Ch, C)  b2: (1, C)
    x = x_ref[...].astype(jnp.float32)                     # upcast in-register
    tb = x.shape[0]

    # Global average / max pool over the spatial (lane) axis.
    avg = jnp.mean(x, axis=2)                              # (TB, C)
    mx = jnp.max(x, axis=2)                                # (TB, C)
    pooled = jnp.concatenate([avg, mx], axis=0)            # (2*TB, C)

    # Shared MLP (the two 1x1 convs) on all pooled rows at once.
    h = jnp.dot(pooled, w1_ref[...],
                preferred_element_type=jnp.float32) + b1_ref[...]   # (2*TB, Ch)
    h = jnp.maximum(h, 0.0)
    y = jnp.dot(h, w2_ref[...],
                preferred_element_type=jnp.float32) + b2_ref[...]   # (2*TB, C)

    # fus(avg) + fus(max)  (bias b2 applied twice, matching PyTorch),
    # sigmoid -> per-channel mask, then gate the input.
    mask = jax.nn.sigmoid(y[:tb] + y[tb:])                 # (TB, C)
    o_ref[...] = (x * mask[:, :, None]).astype(o_ref.dtype)


# --------------------------------- wrapper -----------------------------------

def _pick_block_batch(B, per_elem_bytes, target_bytes=2 << 20, min_grid=2):
    """Largest divisor TB of B with TB*per_elem_bytes <= target, keeping the
    grid length >= min_grid whenever B allows it (v7x has 2 TensorCores)."""
    best = 1
    for d in range(1, B + 1):
        if B % d:
            continue
        if d * per_elem_bytes > target_bytes:
            continue
        if B >= min_grid and B // d < min_grid:
            continue
        best = max(best, d)
    return best


def ca_forward(params, x):
    """Channel attention.  x: (B, C, H, W) NCHW -> (B, C, H, W), same dtype."""
    w1, b1, w2, b2 = params                     # (C,Ch), (1,Ch), (Ch,C), (1,C)
    B, C, H, W = x.shape
    HW = H * W
    Ch = w1.shape[1]
    x2 = x.reshape(B, C, HW)                    # contiguous merge, no copy

    itemsize = jnp.dtype(x.dtype).itemsize
    TB = _pick_block_batch(B, C * HW * itemsize)
    nb = B // TB

    cost = pl.CostEstimate(
        flops=B * (3 * C * HW + 8 * C * Ch),
        transcendentals=B * C,
        bytes_accessed=2 * B * C * HW * itemsize + 2 * C * Ch * 4,
    )

    out = pl.pallas_call(
        _ca_kernel,
        out_shape=jax.ShapeDtypeStruct((B, C, HW), x.dtype),
        grid=(nb,),
        in_specs=[
            pl.BlockSpec((TB, C, HW), lambda i: (i, 0, 0)),
            pl.BlockSpec((C, Ch), lambda i: (0, 0)),
            pl.BlockSpec((1, Ch), lambda i: (0, 0)),
            pl.BlockSpec((Ch, C), lambda i: (0, 0)),
            pl.BlockSpec((1, C), lambda i: (0, 0)),
        ],
        out_specs=pl.BlockSpec((TB, C, HW), lambda i: (i, 0, 0)),
        compiler_params=pltpu.CompilerParams(
            dimension_semantics=("parallel",)),
        cost_estimate=cost,
    )(x2, w1, b1, w2, b2)
    return out.reshape(B, C, H, W)


ca_forward_jit = jax.jit(ca_forward)


# ---------------------------- parameter helpers ------------------------------

def init_ca_params(key, in_ch):
    """Conv2d(in_ch, in_ch//2, 1) -> ReLU -> Conv2d(in_ch//2, in_ch, 1),
    stored kernel-friendly: transposed matmul weights + lane-major biases."""
    ch = in_ch // 2
    k1, k2, k3, k4 = jax.random.split(key, 4)
    w1 = jax.random.normal(k1, (in_ch, ch), jnp.float32) / jnp.sqrt(float(in_ch))
    b1 = 0.01 * jax.random.normal(k2, (1, ch), jnp.float32)
    w2 = jax.random.normal(k3, (ch, in_ch), jnp.float32) / jnp.sqrt(float(ch))
    b2 = 0.01 * jax.random.normal(k4, (1, in_ch), jnp.float32)
    return (w1, b1, w2, b2)


def ca_reference(params, x):
    """Pure-JAX reference of the PyTorch CA.forward (for correctness check)."""
    w1, b1, w2, b2 = params
    avg = jnp.mean(x, axis=(2, 3))                  # (B, C)
    mx = jnp.max(x, axis=(2, 3))                    # (B, C)

    def fus(v):                                     # v: (B, C)
        h = jnp.maximum(v @ w1 + b1, 0.0)
        return h @ w2 + b2

    mask = jax.nn.sigmoid(fus(avg) + fus(mx))       # (B, C)
    return x * mask[:, :, None, None]


# ----------------------------------- main ------------------------------------

if __name__ == "__main__":
    key = jax.random.PRNGKey(0)
    kx, kp = jax.random.split(key)

    B, C, H, W = 2, 64, 16, 16                      # small shapes; H*W lane-dense
    x = jax.random.normal(kx, (B, C, H, W), jnp.float32)
    params = init_ca_params(kp, C)

    out = jax.block_until_ready(ca_forward_jit(params, x))
    assert out.shape == (B, C, H, W), out.shape
    assert out.dtype == x.dtype, out.dtype
    assert bool(jnp.all(jnp.isfinite(out)))

    ref = ca_reference(params, x)
    err = float(jnp.max(jnp.abs(out - ref)))
    assert err < 1e-4, f"max abs err {err}"

    print("KERNEL_OK")
</pallas_src>

<mosaic_0001>
module attributes {stable_mosaic.version = 11 : i64} {
  func.func @_ca_kernel(%arg0: i32, %arg1: memref<1x64x256xf32, #tpu.memory_space<vmem>>, %arg2: memref<64x32xf32, #tpu.memory_space<vmem>>, %arg3: memref<1x32xf32, #tpu.memory_space<vmem>>, %arg4: memref<32x64xf32, #tpu.memory_space<vmem>>, %arg5: memref<1x64xf32, #tpu.memory_space<vmem>>, %arg6: memref<1x64x256xf32, #tpu.memory_space<vmem>>) attributes {dimension_semantics = [#tpu.dimension_semantics<parallel>], iteration_bounds = array<i64: 2>, scalar_prefetch = 0 : i64, scratch_operands = 0 : i64, tpu.core_type = #tpu.core_type<tc>, window_params = [{transform_indices = @transform_0, window_bounds = array<i64: 1, 64, 256>}, {pipeline_mode = #tpu.pipeline_mode<synchronous>, transform_indices = @transform_1, window_bounds = array<i64: 64, 32>}, {pipeline_mode = #tpu.pipeline_mode<synchronous>, transform_indices = @transform_2, window_bounds = array<i64: 1, 32>}, {pipeline_mode = #tpu.pipeline_mode<synchronous>, transform_indices = @transform_3, window_bounds = array<i64: 32, 64>}, {pipeline_mode = #tpu.pipeline_mode<synchronous>, transform_indices = @transform_4, window_bounds = array<i64: 1, 64>}, {transform_indices = @transform_5, window_bounds = array<i64: 1, 64, 256>}]} {
    %c0 = arith.constant 0 : index
    %c0_0 = arith.constant 0 : index
    %c0_1 = arith.constant 0 : index
    %0 = vector.load %arg1[%c0, %c0_0, %c0_1] : memref<1x64x256xf32, #tpu.memory_space<vmem>>, vector<1x64x256xf32>
    %cst = arith.constant dense<0.000000e+00> : vector<1x64xf32>
    %1 = vector.multi_reduction <add>, %0, %cst [2] : vector<1x64x256xf32> to vector<1x64xf32>
    %cst_2 = arith.constant 2.560000e+02 : f32
    %2 = vector.broadcast %cst_2 : f32 to vector<1x64xf32>
    %3 = arith.divf %1, %2 : vector<1x64xf32>
    %cst_3 = arith.constant dense<0xFF800000> : vector<1x64xf32>
    %4 = vector.multi_reduction <maximumf>, %0, %cst_3 [2] : vector<1x64x256xf32> to vector<1x64xf32>
    %5 = tpu.concatenate %3, %4 in 0 : vector<1x64xf32>, vector<1x64xf32> -> vector<2x64xf32>
    %c0_4 = arith.constant 0 : index
    %c0_5 = arith.constant 0 : index
    %6 = vector.load %arg2[%c0_4, %c0_5] : memref<64x32xf32, #tpu.memory_space<vmem>>, vector<64x32xf32>
    %cst_6 = arith.constant dense<0.000000e+00> : vector<2x32xf32>
    %7 = tpu.matmul %5, %6, %cst_6 {dimension_numbers = #tpu.dot_dimension_numbers<[1], [0], [0], [1], [0, 0, 1, 1], [], []>} : vector<2x64xf32>, vector<64x32xf32>, vector<2x32xf32> -> vector<2x32xf32>
    %c0_7 = arith.constant 0 : index
    %c0_8 = arith.constant 0 : index
    %8 = vector.load %arg3[%c0_7, %c0_8] : memref<1x32xf32, #tpu.memory_space<vmem>>, vector<1x32xf32>
    %9 = vector.broadcast %8 : vector<1x32xf32> to vector<2x32xf32>
    %10 = arith.addf %7, %9 : vector<2x32xf32>
    %cst_9 = arith.constant 0.000000e+00 : f32
    %11 = vector.broadcast %cst_9 : f32 to vector<2x32xf32>
    %12 = arith.maximumf %10, %11 : vector<2x32xf32>
    %c0_10 = arith.constant 0 : index
    %c0_11 = arith.constant 0 : index
    %13 = vector.load %arg4[%c0_10, %c0_11] : memref<32x64xf32, #tpu.memory_space<vmem>>, vector<32x64xf32>
    %cst_12 = arith.constant dense<0.000000e+00> : vector<2x64xf32>
    %14 = tpu.matmul %12, %13, %cst_12 {dimension_numbers = #tpu.dot_dimension_numbers<[1], [0], [0], [1], [0, 0, 1, 1], [], []>} : vector<2x32xf32>, vector<32x64xf32>, vector<2x64xf32> -> vector<2x64xf32>
    %c0_13 = arith.constant 0 : index
    %c0_14 = arith.constant 0 : index
    %15 = vector.load %arg5[%c0_13, %c0_14] : memref<1x64xf32, #tpu.memory_space<vmem>>, vector<1x64xf32>
    %16 = vector.broadcast %15 : vector<1x64xf32> to vector<2x64xf32>
    %17 = arith.addf %14, %16 : vector<2x64xf32>
    %18 = vector.extract_strided_slice %17 {offsets = [0, 0], sizes = [1, 64], strides = [1, 1]} : vector<2x64xf32> to vector<1x64xf32>
    %19 = vector.extract_strided_slice %17 {offsets = [1, 0], sizes = [1, 64], strides = [1, 1]} : vector<2x64xf32> to vector<1x64xf32>
    %20 = arith.addf %18, %19 : vector<1x64xf32>
    %21 = arith.negf %20 : vector<1x64xf32>
    %22 = math.exp %21 : vector<1x64xf32>
    %cst_15 = arith.constant 1.000000e+00 : f32
    %23 = vector.broadcast %cst_15 : f32 to vector<1x64xf32>
    %24 = arith.addf %23, %22 : vector<1x64xf32>
    %25 = arith.divf %23, %24 : vector<1x64xf32>
    %26 = vector.shape_cast %25 : vector<1x64xf32> to vector<1x64x1xf32>
    %27 = vector.broadcast %26 : vector<1x64x1xf32> to vector<1x64x256xf32>
    %28 = arith.mulf %0, %27 : vector<1x64x256xf32>
    %c0_16 = arith.constant 0 : index
    %c0_17 = arith.constant 0 : index
    %c0_18 = arith.constant 0 : index
    %29 = vector.load %arg6[%c0_16, %c0_17, %c0_18] : memref<1x64x256xf32, #tpu.memory_space<vmem>>, vector<1x64x256xf32>
    tpu.vector_store %arg6[%c0_16, %c0_17, %c0_18], %28 {strides = array<i32>} : memref<1x64x256xf32, #tpu.memory_space<vmem>>, vector<1x64x256xf32>,
    return
  }
  func.func @transform_0(%arg0: i32) -> (i32, i32, i32) {
    %c0_i32 = arith.constant 0 : i32
    %c0_i32_0 = arith.constant 0 : i32
    %c0_i32_1 = arith.constant 0 : i32
    return %arg0, %c0_i32, %c0_i32_0 : i32, i32, i32
  }
  func.func @transform_1(%arg0: i32) -> (i32, i32) {
    %c0_i32 = arith.constant 0 : i32
    %c0_i32_0 = arith.constant 0 : i32
    %c0_i32_1 = arith.constant 0 : i32
    return %c0_i32, %c0_i32_0 : i32, i32
  }
  func.func @transform_2(%arg0: i32) -> (i32, i32) {
    %c0_i32 = arith.constant 0 : i32
    %c0_i32_0 = arith.constant 0 : i32
    %c0_i32_1 = arith.constant 0 : i32
    return %c0_i32, %c0_i32_0 : i32, i32
  }
  func.func @transform_3(%arg0: i32) -> (i32, i32) {
    %c0_i32 = arith.constant 0 : i32
    %c0_i32_0 = arith.constant 0 : i32
    %c0_i32_1 = arith.constant 0 : i32
    return %c0_i32, %c0_i32_0 : i32, i32
  }
  func.func @transform_4(%arg0: i32) -> (i32, i32) {
    %c0_i32 = arith.constant 0 : i32
    %c0_i32_0 = arith.constant 0 : i32
    %c0_i32_1 = arith.constant 0 : i32
    return %c0_i32, %c0_i32_0 : i32, i32
  }
  func.func @transform_5(%arg0: i32) -> (i32, i32, i32) {
    %c0_i32 = arith.constant 0 : i32
    %c0_i32_0 = arith.constant 0 : i32
    %c0_i32_1 = arith.constant 0 : i32
    return %arg0, %c0_i32, %c0_i32_0 : i32, i32, i32
  }
}

</mosaic_0001>

<bundles_post_ra>
// kernel: ca_forward.1
= control target key start
LH: loop header
LB: loop body
LE: loop exit
PB: predicated region body
PF: predicated region fallthrough
CT: control target
= control target key end

     0   :  { %s855_s18 = smov 0   ;;  %s1056_s0 = inlined_call_operand.vmem [shape: f32[2,64,256], index: 0, kind: input, shape index: {}]   ;;  %s1057_s1 = inlined_call_operand.vmem [shape: f32[64,32], index: 1, kind: input, shape index: {}]   ;;  %s1058_s2 = inlined_call_operand.vmem [shape: f32[1,32], index: 2, kind: input, shape index: {}]   ;;  %s1059_s3 = inlined_call_operand.vmem [shape: f32[32,64], index: 3, kind: input, shape index: {}]   ;;  %s1060_s4 = inlined_call_operand.vmem [shape: f32[1,64], index: 4, kind: input, shape index: {}]   ;;  %s1061_s5 = inlined_call_operand.vmem [shape: f32[2,64,256], index: 5, kind: output, shape index: {}]  }
   0x1 LB: > { %s719_s19 = sadd.s32 4294967295, %s820_s18   ;;  %p723_p0 = scmp.ge.s32.totalorder %s820_s18, 1  ;;  %s820_s18 = sphi %s855_s18, %s15_s18  }
   0x2   : > { %p187_p1 = scmp.lt.s32.totalorder %s820_s18, 3 }
   0x4   : > { %p188_p2 = pnand %p723_p0, %p187_p1 }
   0x5   : > { %p215_p3 = scmp.lt.s32.totalorder (!%p188_p2), %s719_s19, 1  ;;  %v412_v32 = vld [vmem:[%s1057_s1] sm:$0xff] (!%p188_p2)  ;;  %v413_v33 = vld [vmem:[%s1057_s1 + $0x8] sm:$0xff] (!%p188_p2)  ;;  %v822_v35 = vmov (!%p188_p2), 0.0|0.0   ;;  %v414_v36 = vld [vmem:[%s1057_s1 + $0x10] sm:$0xff] (!%p188_p2)  ;;  %vm823_vm0 = vmmov (!%p188_p2), 0   ;;  %v306_v52 = vlaneseq (!%p188_p2) }
   0x6   : > { %191 = sbr.rel (%p188_p2) target bundleno = 791 (0x317), region = 40  ;;  %v782_v34 = vpack.c.bf16 (!%p188_p2), %v413_v33, %v412_v32  ;;  %781 = vmatprep.subr.bf16.mxu0 (!%p188_p2), %v822_v35  ;;  %793 = vmatprep.subr.bf16.mxu1 (!%p188_p2), %v822_v35  ;;  %v415_v37 = vld [vmem:[%s1057_s1 + $0x18] sm:$0xff] (!%p188_p2)  ;;  %v416_v39 = vld [vmem:[%s1057_s1 + $0x20] sm:$0xff] (!%p188_p2)  ;;  %v417_v40 = vld [vmem:[%s1057_s1 + $0x28] sm:$0xff] (!%p188_p2)  ;;  %v824_v45 = vmov (!%p188_p2), 0.0   ;;  %vm317_vm1 = vcmask (!%p188_p2), 130112  }
   0x7   : > { %v785_v38 = vpack.c.bf16 (!%p188_p2), %v415_v37, %v414_v36  ;;  %v788_v41 = vpack.c.bf16 (!%p188_p2), %v417_v40, %v416_v39  ;;  %v418_v42 = vld [vmem:[%s1057_s1 + $0x30] sm:$0xff] (!%p188_p2)  ;;  %v419_v43 = vld [vmem:[%s1057_s1 + $0x38] sm:$0xff] (!%p188_p2)  ;;  %767 = vmatprep.mubr.msk.f32.mxu0 (!%p188_p2), %vm823_vm0, %v824_v45  ;;  %778 = vmatprep.mubr.msk.f32.mxu1 (!%p188_p2), %vm823_vm0, %v824_v45  ;;  %v502_v46 = vld [vmem:[%s1059_s3] sm:$0xff] (!%p188_p2)  ;;  %v307_v55 = vand.u32 (!%p188_p2), 127, %v306_v52  ;;  %v983_v59 = vshrl.u32 (!%p188_p2), %v306_v52, 7 }
   0x8   : > { %783 = vmatpush3.bf16.msra.mxu0 (!%p188_p2), %v782_v34  ;;  %v791_v44 = vpack.c.bf16 (!%p188_p2), %v419_v43, %v418_v42  ;;  %v503_v47 = vld [vmem:[%s1059_s3 + $0x8] sm:$0xff] (!%p188_p2)  ;;  %vm324_vm2 = vcmask (!%p188_p2), 195712   ;;  %vm331_vm3 = vcmask (!%p188_p2), 261312   ;;  %vm338_vm4 = vcmask (!%p188_p2), 326912  }
   0x9   : > { %784 = vmatprep.subr.bf16.mxu0 (!%p188_p2), %v822_v35  ;;  %v794_v48 = vpack.c.bf16 (!%p188_p2), %v503_v47, %v502_v46  ;;  %v312_v57 = vadd.s32 (!%p188_p2), 4294967288, %v307_v55  ;;  %v319_v63 = vadd.s32 (!%p188_p2), 4294967280, %v307_v55  ;;  %v354_v32 = vadd.s32 (!%p188_p2), 4294967240, %v307_v55 }
   0xa   : > { %vm345_vm5 = vcmask (!%p188_p2), 392512   ;;  %vm352_vm6 = vcmask (!%p188_p2), 458112   ;;  %vm359_vm7 = vcmask (!%p188_p2), 523712   ;;  %vm410_vm8 = vcmask (!%p188_p2), 1040384  }
   0xb   : > { %795 = vmatpush3.bf16.msra.mxu1 (!%p188_p2), %v794_v48  ;;  %v315_v61 = vsub.s32 (!%p188_p2), %v312_v57, %v983_v59  ;;  %v357_v47 = vsub.s32 (!%p188_p2), %v354_v32, %v983_v59  ;;  %vm427_vm9 = vcmask (!%p188_p2), 523264   ;;  %vm513_vm10 = vcmask (!%p188_p2), 261120  }
   0xc   : > { %786 = vmatpush3.bf16.msra.mxu0 (!%p188_p2), %v785_v38  ;;  %796 = vmatprep.subr.bf16.mxu1 (!%p188_p2), %v822_v35 }
   0xd   : > { %s1063_s19 = smov (!%p215_p3, %s719_s19), 1  ;;  %787 = vmatprep.subr.bf16.mxu0 %v822_v35 }
   0xe   : > { %s735_s20 = sshll.u32 %s1063_s19, 7 }
   0xf   : > { %s871_s23 = scalar_lea.vmem %s1056_s0, %s735_s20  ;;  %s1019_s7 = scalar_lea.vmem %s1061_s5, %s735_s20 }
  0x10   : > { %v874_v0 = vld [vmem:[%s871_s23 + $0x20] sm:$0xff]  ;;  %v877_v1 = vld [vmem:[%s871_s23 + $0x28] sm:$0xff]  ;;  %v888_v5 = vld [vmem:[%s871_s23 + $0x30] sm:$0xff]  ;;  %789 = vmatpush3.bf16.msra.mxu0 %v788_v41 }
  0x11   : > { %v880_v2 = vld [vmem:[%s871_s23] sm:$0xff]  ;;  %v247_v3 = vadd.f32 %v877_v1, %v874_v0  ;;  %v885_v4 = vld [vmem:[%s871_s23 + $0x8] sm:$0xff]  ;;  %v891_v6 = vld [vmem:[%s871_s23 + $0x38] sm:$0xff]  ;;  %v280_v16 = vmax.f32 %v874_v0, %v877_v1  ;;  %790 = vmatprep.subr.bf16.mxu0 %v822_v35 }
  0x12   : > { %v241_v7 = vadd.f32 %v885_v4, %v880_v2  ;;  %v896_v8 = vld [vmem:[%s871_s23 + $0x10] sm:$0xff]  ;;  %v899_v9 = vld [vmem:[%s871_s23 + $0x18] sm:$0xff]  ;;  %v250_v10 = vadd.f32 %v891_v6, %v888_v5  ;;  %v274_v13 = vmax.f32 %v880_v2, %v885_v4  ;;  %v910_v14 = vld [vmem:[%s871_s23 + $0x40] sm:$0xff]  ;;  %v283_v20 = vmax.f32 %v888_v5, %v891_v6 }
  0x13   : > { %248 = vadd.xlane.f32.xlu1 %v247_v3  ;;  %v244_v11 = vadd.f32 %v899_v9, %v896_v8  ;;  %v277_v12 = vmax.f32 %v896_v8, %v899_v9  ;;  %v913_v15 = vld [vmem:[%s871_s23 + $0x48] sm:$0xff]  ;;  %v920_v18 = vld [vmem:[%s871_s23 + $0x50] sm:$0xff]  ;;  %v923_v19 = vld [vmem:[%s871_s23 + $0x58] sm:$0xff] }
  0x14   : > { %242 = vadd.xlane.f32.xlu0 %v241_v7  ;;  %v253_v17 = vadd.f32 %v913_v15, %v910_v14  ;;  %v256_v21 = vadd.f32 %v923_v19, %v920_v18  ;;  %v930_v22 = vld [vmem:[%s871_s23 + $0x60] sm:$0xff]  ;;  %v933_v23 = vld [vmem:[%s871_s23 + $0x68] sm:$0xff]  ;;  %v286_v24 = vmax.f32 %v910_v14, %v913_v15  ;;  %v940_v26 = vld [vmem:[%s871_s23 + $0x70] sm:$0xff]  ;;  %v289_v28 = vmax.f32 %v920_v18, %v923_v19 }
  0x15   : > { %v259_v25 = vadd.f32 %v933_v23, %v930_v22  ;;  %v943_v27 = vld [vmem:[%s871_s23 + $0x78] sm:$0xff]  ;;  %v292_v31 = vmax.f32 %v930_v22, %v933_v23  ;;  %792 = vmatpush3.bf16.msra.mxu0 %v791_v44  ;;  %v310_v7 = vsub.s32 %v307_v55, %v983_v59 }
  0x16   : > { %v262_v29 = vadd.f32 %v943_v27, %v940_v26  ;;  %v295_v30 = vmax.f32 %v940_v26, %v943_v27 }
  0x17   : > { %251 = vadd.xlane.f32.xlu1 %v250_v10 }
  0x18   : > { %245 = vadd.xlane.f32.xlu0 %v244_v11  ;;  %v326_v11 = vadd.s32 4294967272, %v307_v55 }
  0x1b   : > { %278 = vmax.xlane.f32.xlu1 %v277_v12 }
  0x1c   : > { %275 = vmax.xlane.f32.xlu0 %v274_v13  ;;  %v333_v13 = vadd.s32 4294967264, %v307_v55 }
  0x1e   : > { %v336_v33 = vsub.s32 %v333_v13, %v983_v59 }
  0x1f   : > { %281 = vmax.xlane.f32.xlu1 %v280_v16  ;;  %v340_v16 = vadd.s32 4294967256, %v307_v55 }
  0x20   : > { %254 = vadd.xlane.f32.xlu0 %v253_v17 }
  0x21   : > { %v343_v35 = vsub.s32 %v340_v16, %v983_v59 }
  0x23   : > { %284 = vmax.xlane.f32.xlu1 %v283_v20  ;;  %v322_v20 = vsub.s32 %v319_v63, %v983_v59 }
  0x24   : > { %257 = vadd.xlane.f32.xlu0 %v256_v21 }
  0x27   : > { %287 = vmax.xlane.f32.xlu1 %v286_v24 }
  0x28   : > { %260 = vadd.xlane.f32.xlu0 %v259_v25  ;;  %v347_v25 = vadd.s32 4294967248, %v307_v55 }
  0x2a   : > { %v350_v42 = vsub.s32 %v347_v25, %v983_v59  ;;  %v504_v25 = vld [vmem:[%s1059_s3 + $0x10] sm:$0xff] }
  0x2b   : > { %290 = vmax.xlane.f32.xlu1 %v289_v28 }
  0x2c   : > { %263 = vadd.xlane.f32.xlu0 %v262_v29  ;;  %v329_v29 = vsub.s32 %v326_v11, %v983_v59 }
  0x2f   : > { %296 = vmax.xlane.f32.xlu1 %v295_v30 }
  0x30   : > { %293 = vmax.xlane.f32.xlu0 %v292_v31 }
  0xa0   : > { %v249_v49 = vpop.xlane.xlu1 %248 }
  0xa1   : > { %v243_v50 = vpop.xlane.xlu0 %242  ;;  %v268_v21 = vmul.f32 0.00390625, %v249_v49 }
  0xa2   : > { %v266_v10 = vmul.f32 0.00390625, %v243_v50 }
  0xa3   : > { %v323_v40 = vrot.slane %v268_v21, %v322_v20 }
  0xa4   : > { %v252_v51 = vpop.xlane.xlu1 %251  ;;  %v311_v28 = vrot.slane %v266_v10, %v310_v7 }
  0xa5   : > { %v246_v53 = vpop.xlane.xlu0 %245  ;;  %v269_v30 = vmul.f32 0.00390625, %v252_v51 }
  0xa6   : > { %v267_v62 = vmul.f32 0.00390625, %v246_v53 }
  0xa7   : > { %v330_v45 = vrot.slane %v269_v30, %v329_v29  ;;  %v728_v30 = vld [vmem:[%s1058_s2] ss:$0 sm:$0xff] }
  0xa8   : > { %v279_v54 = vpop.xlane.xlu1 %278  ;;  %v316_v17 = vrot.slane %v267_v62, %v315_v61 }
  0xa9   : > { %v276_v56 = vpop.xlane.xlu0 %275  ;;  %v377_v37 = vrot.slane %v279_v54, %v315_v61 }
  0xaa   : > { %v318_v36 = vsel %vm317_vm1, %v316_v17, %v311_v28  ;;  %v373_v38 = vrot.slane %v276_v56, %v310_v7  ;;  %v505_v28 = vld [vmem:[%s1059_s3 + $0x18] sm:$0xff] }
  0xab   : > { %v325_v49 = vsel %vm324_vm2, %v323_v40, %v318_v36 }
  0xac   : > { %v282_v58 = vpop.xlane.xlu1 %281  ;;  %v378_v53 = vsel %vm317_vm1, %v377_v37, %v373_v38 }
  0xad   : > { %v255_v60 = vpop.xlane.xlu0 %254  ;;  %v382_v41 = vrot.slane %v282_v58, %v322_v20 }
  0xae   : > { %v270_v34 = vmul.f32 0.00390625, %v255_v60  ;;  %v332_v60 = vsel %vm331_vm3, %v330_v45, %v325_v49 }
  0xaf   : > { %v383_v56 = vsel %vm324_vm2, %v382_v41, %v378_v53 }
  0xb0   : > { %v285_v3 = vpop.xlane.xlu1 %284  ;;  %v337_v50 = vrot.slane %v270_v34, %v336_v33 }
  0xb1   : > { %v258_v12 = vpop.xlane.xlu0 %257  ;;  %v387_v46 = vrot.slane %v285_v3, %v329_v29  ;;  %v797_v29 = vpack.c.bf16 %v505_v28, %v504_v25 }
  0xb2   : > { %v271_v39 = vmul.f32 0.00390625, %v258_v12  ;;  %v339_v7 = vsel %vm338_vm4, %v337_v50, %v332_v60 }
  0xb3   : > { %v388_v61 = vsel %vm331_vm3, %v387_v46, %v383_v56  ;;  %798 = vmatpush3.bf16.msra.mxu1 %v797_v29 }
  0xb4   : > { %v288_v24 = vpop.xlane.xlu1 %287  ;;  %v344_v54 = vrot.slane %v271_v39, %v343_v35 }
  0xb5   : > { %v261_v31 = vpop.xlane.xlu0 %260  ;;  %v392_v51 = vrot.slane %v288_v24, %v336_v33 }
  0xb6   : > { %v272_v43 = vmul.f32 0.00390625, %v261_v31  ;;  %v346_v12 = vsel %vm345_vm5, %v344_v54, %v339_v7 }
  0xb7   : > { %v393_v10 = vsel %vm338_vm4, %v392_v51, %v388_v61 }
  0xb8   : > { %v291_v44 = vpop.xlane.xlu1 %290  ;;  %v351_v57 = vrot.slane %v272_v43, %v350_v42 }
  0xb9   : > { %v264_v48 = vpop.xlane.xlu0 %263  ;;  %v397_v55 = vrot.slane %v291_v44, %v343_v35  ;;  %v730_v35 = vld [vmem:[%s1060_s4] ss:$0 sm:$0xff]  ;;  %v599_v44 = vsub.s32 0, %v983_v59 }
  0xba   : > { %v273_v52 = vmul.f32 0.00390625, %v264_v48  ;;  %v353_v16 = vsel %vm352_vm6, %v351_v57, %v346_v12 }
  0xbb   : > { %v398_v13 = vsel %vm345_vm5, %v397_v55, %v393_v10 }
  0xbc   : > { %v297_v58 = vpop.xlane.xlu1 %296  ;;  %v358_v62 = vrot.slane %v273_v52, %v357_v47 }
  0xbd   : > { %v294_v63 = vpop.xlane.xlu0 %293  ;;  %v407_v3 = vrot.slane %v297_v58, %v357_v47 }
  0xbe   : > { %v402_v11 = vrot.slane %v294_v63, %v350_v42  ;;  %v360_v21 = vsel %vm359_vm7, %v358_v62, %v353_v16 }
  0xc0   : > { %v403_v17 = vsel %vm352_vm6, %v402_v11, %v398_v13 }
  0xc1   : > { %v408_v20 = vsel %vm359_vm7, %v407_v3, %v403_v17 }
  0xc2   : > { %v411_v24 = vsel %vm410_vm8, %v360_v21, %v408_v20 }
  0xc3   : > { %768 = vmatmul.mubr.msk.f32.vlgmr.msra.gmra.mrb[0].mxu0 %vm427_vm9, %v411_v24 }
 0x196   : > { %v497_v31 = vpop.f32.mrb[0].mxu0 }
 0x197   : > { %v498_v32 = vadd.f32 %v728_v30, %v497_v31  ;;  %v769_v33 = vpop.f32.mrb[1].mxu0 }
 0x199   : > { %v501_v34 = vmax.f32 %v498_v32, 0.0 }
 0x19b   : > { %779 = vmatmul.mubr.msk.f32.vlgmr.msra.gmra.mrb[0].mxu1 %vm513_vm10, %v501_v34 }
 0x26e   : > { %v583_v36 = vpop.f32.mrb[0].mxu1 }
 0x26f   : > { %v584_v37 = vadd.f32 %v730_v35, %v583_v36  ;;  %v780_v38 = vpop.f32.mrb[1].mxu1 }
 0x271   : > { %v588_v39 = vrot.slane %v584_v37, 1 }
 0x273   : > { %v590_v40 = vadd.f32 %v588_v39, %v584_v37 }
 0x275   : > { %v732_v41 = vmul.f32 -1.442695, %v590_v40 }
 0x277   : > { %810 = vpow2.f32 %v732_v41 }
 0x281   : > { %v811_v42 = vpop.eup %810 }
 0x282   : > { %v594_v43 = vadd.f32 1.0, %v811_v42 }
 0x284   : > { %812 = vrcp.f32 %v594_v43 }
 0x28e   : > { %v813_v45 = vpop.eup %812 }
 0x28f   : > { %v600_v46 = vrot.slane %v813_v45, %v599_v44 }
 0x291   : > { %606 = vbcast.lane.b32.xlu1 %v600_v46, 264  ;;  %602 = vbcast.lane.b32.xlu0 %v600_v46, 256 }
 0x295   : > { %610 = vbcast.lane.b32.xlu1 %v600_v46, 272  ;;  %618 = vbcast.lane.b32.xlu0 %v600_v46, 288 }
 0x299   : > { %614 = vbcast.lane.b32.xlu1 %v600_v46, 280  ;;  %626 = vbcast.lane.b32.xlu0 %v600_v46, 304 }
 0x29d   : > { %622 = vbcast.lane.b32.xlu1 %v600_v46, 296 }
 0x2a1   : > { %630 = vbcast.lane.b32.xlu1 %v600_v46, 312 }
 0x303   : > { %v607_v59 = vpop.permute.xlu1 %606  ;;  %v603_v47 = vpop.permute.xlu0 %602 }
 0x304   : > { %v634_v48 = vmul.f32 %v607_v59, %v896_v8  ;;  %v635_v49 = vmul.f32 %v607_v59, %v899_v9  ;;  %v632_v50 = vmul.f32 %v603_v47, %v880_v2  ;;  %v633_v51 = vmul.f32 %v603_v47, %v885_v4 }
 0x306   : > { %650 = vst [vmem:[%s1019_s7 + $0x10] sm:$0xff] %v634_v48  ;;  %651 = vst [vmem:[%s1019_s7 + $0x18] sm:$0xff] %v635_v49 }
 0x307   : > { %648 = vst [vmem:[%s1019_s7] sm:$0xff] %v632_v50  ;;  %649 = vst [vmem:[%s1019_s7 + $0x8] sm:$0xff] %v633_v51  ;;  %v611_v52 = vpop.permute.xlu1 %610  ;;  %v619_v53 = vpop.permute.xlu0 %618 }
 0x308   : > { %v636_v54 = vmul.f32 %v611_v52, %v874_v0  ;;  %v637_v8 = vmul.f32 %v611_v52, %v877_v1  ;;  %v640_v9 = vmul.f32 %v619_v53, %v910_v14  ;;  %v641_v2 = vmul.f32 %v619_v53, %v913_v15 }
 0x30a   : > { %652 = vst [vmem:[%s1019_s7 + $0x20] sm:$0xff] %v636_v54  ;;  %653 = vst [vmem:[%s1019_s7 + $0x28] sm:$0xff] %v637_v8 }
 0x30b   : > { %656 = vst [vmem:[%s1019_s7 + $0x40] sm:$0xff] %v640_v9  ;;  %657 = vst [vmem:[%s1019_s7 + $0x48] sm:$0xff] %v641_v2  ;;  %v615_v4 = vpop.permute.xlu1 %614  ;;  %v627_v55 = vpop.permute.xlu0 %626 }
 0x30c   : > { %v638_v56 = vmul.f32 %v615_v4, %v888_v5  ;;  %v639_v0 = vmul.f32 %v615_v4, %v891_v6  ;;  %v644_v1 = vmul.f32 %v627_v55, %v930_v22  ;;  %v645_v14 = vmul.f32 %v627_v55, %v933_v23 }
 0x30e   : > { %654 = vst [vmem:[%s1019_s7 + $0x30] sm:$0xff] %v638_v56  ;;  %655 = vst [vmem:[%s1019_s7 + $0x38] sm:$0xff] %v639_v0 }
 0x30f   : > { %660 = vst [vmem:[%s1019_s7 + $0x60] sm:$0xff] %v644_v1  ;;  %661 = vst [vmem:[%s1019_s7 + $0x68] sm:$0xff] %v645_v14  ;;  %v623_v15 = vpop.permute.xlu1 %622 }
 0x310   : > { %v642_v57 = vmul.f32 %v623_v15, %v920_v18  ;;  %v643_v58 = vmul.f32 %v623_v15, %v923_v19 }
 0x312   : > { %658 = vst [vmem:[%s1019_s7 + $0x50] sm:$0xff] %v642_v57  ;;  %659 = vst [vmem:[%s1019_s7 + $0x58] sm:$0xff] %v643_v58 }
 0x313   : > { %v631_v5 = vpop.permute.xlu1 %630 }
 0x314   : > { %v646_v60 = vmul.f32 %v631_v5, %v940_v26  ;;  %v647_v6 = vmul.f32 %v631_v5, %v943_v27 }
 0x316   : > { %662 = vst [vmem:[%s1019_s7 + $0x70] sm:$0xff] %v646_v60  ;;  %663 = vst [vmem:[%s1019_s7 + $0x78] sm:$0xff] %v647_v6 }
 0x317 PF: > { %s15_s18 = sadd.s32 1, %s820_s18  }
 0x318   : > { %p12_p4 = scmp.ge.s32.totalorder %s15_s18, 4  }
 0x31a   :  { %14 = sbr.rel (!%p12_p4) target bundleno = 1 (0x1), region = 70 }

</bundles_post_ra>
